<compile_context>
chip_gen: v7x
topology: tpu7x:2x2x1
jax: 0.10.0
libtpu: 0.0.40
codegen_flags: <defaults>
</compile_context>

<pallas_src>
import jax
import jax.numpy as jnp
from jax.experimental import pallas as pl
from jax.experimental.pallas import tpu as pltpu


def fwls_kernel(w_ref, b_ref, cond_ref, pred_ref, out_ref):
    """w_ref:(P,K) SMEM, b_ref:(P,) SMEM; cond_ref:(K,tr,128), pred_ref:(P,tr,128), out_ref:(tr,128)."""
    P = pred_ref.shape[0]
    K = cond_ref.shape[0]
    # Hoisted, once-per-tile full loads (each element touched exactly once from VMEM).
    cond = cond_ref[...].astype(jnp.float32)   # (K, tr, 128) — full (8,128)-dense vregs
    pred = pred_ref[...].astype(jnp.float32)   # (P, tr, 128)
    acc = None
    # P, K are tiny -> fully unrolled scalar-splat VPU FMAs on full (tr, 128) tiles.
    for p in range(P):
        fw = w_ref[p, 0] * cond[0]
        for k in range(1, K):
            fw = fw + w_ref[p, k] * cond[k]
        term = (fw + b_ref[p]) * pred[p]        # bias folded as a scalar add
        acc = term if acc is None else acc + term
    out_ref[...] = acc.astype(out_ref.dtype)


def fwls_forward(cond_kb, preds_pb, fw_weight, fw_bias, *, block_elems=65536):
    """FWLS combine.

    cond_kb  : (K, B) float  condition-function values (batch contiguous on last axis)
    preds_pb : (P, B) float  base-predictor outputs
    fw_weight: (P, K) float  per-predictor feature-weight weights
    fw_bias  : (P,)   float  per-predictor feature-weight biases
    returns  : (B,)   float32
    """
    K, B = cond_kb.shape
    P, B2 = preds_pb.shape
    assert B2 == B and fw_weight.shape == (P, K) and fw_bias.shape == (P,)

    LANE, SUB = 128, 8
    rows = pl.cdiv(B, LANE)                                   # batch length in 128-lane groups
    tr_req = max(SUB, (block_elems // LANE // SUB) * SUB)     # requested sublane-rows per step
    if rows >= 2 * SUB:
        # Cap the tile at half the batch so the "parallel" grid axis has >= 2 steps
        # (lets v7x's two TensorCores split the work).
        tr = min(tr_req, (rows // 2 // SUB) * SUB)
    else:
        tr = SUB
    rows_pad = pl.cdiv(rows, tr) * tr
    b_pad = rows_pad * LANE

    f32 = jnp.float32
    w = fw_weight.astype(f32)
    bias = fw_bias.astype(f32)
    if b_pad != B:
        # NOTE: jnp.pad copies the whole array; for huge batches prefer B % (tr*128) == 0
        # upstream.  Padded predictions are zero -> padded lanes contribute nothing and
        # are sliced off below anyway.
        cond_kb = jnp.pad(cond_kb, ((0, 0), (0, b_pad - B)))
        preds_pb = jnp.pad(preds_pb, ((0, 0), (0, b_pad - B)))
    cond_3d = cond_kb.reshape(K, rows_pad, LANE)              # batch -> (sublanes, lanes)
    pred_3d = preds_pb.reshape(P, rows_pad, LANE)

    cost = pl.CostEstimate(
        flops=2 * b_pad * P * (K + 1),
        transcendentals=0,
        bytes_accessed=4 * (b_pad * (K + P + 1) + P * (K + 1)),
    )

    out = pl.pallas_call(
        fwls_kernel,
        out_shape=jax.ShapeDtypeStruct((rows_pad, LANE), f32),
        grid=(rows_pad // tr,),
        in_specs=[
            pl.BlockSpec(memory_space=pltpu.MemorySpace.SMEM),    # fw weights (P, K) scalars
            pl.BlockSpec(memory_space=pltpu.MemorySpace.SMEM),    # fw biases  (P,)   scalars
            pl.BlockSpec((K, tr, LANE), lambda i: (0, i, 0)),     # condition-value tile
            pl.BlockSpec((P, tr, LANE), lambda i: (0, i, 0)),     # predictor-output tile
        ],
        out_specs=pl.BlockSpec((tr, LANE), lambda i: (i, 0)),     # full-sublane, lane-dense out
        compiler_params=pltpu.CompilerParams(
            dimension_semantics=("parallel",),                    # batch axis shards across TCs
            vmem_limit_bytes=32 << 20,
        ),
        cost_estimate=cost,
    )(w, bias, cond_3d, pred_3d)
    return out.reshape(-1)[:B]


if __name__ == "__main__":
    # Small shapes consistent with the module's forward; B deliberately not a multiple
    # of 128 (exercises the padding path) and large enough for a multi-step grid.
    B = 2500  # batch of (user, item) pairs
    D = 32    # latent feature dim of a (user, item) pair for the simulated glue
    K = 8     # number of condition functions fed to each FeatureWeightFunction
    P = 4     # number of base predictors in the ensemble

    key = jax.random.PRNGKey(0)
    k_x, k_cond, k_pred, k_w, k_b = jax.random.split(key, 5)

    # Simulated user_item_batch features (stands in for embedded (user, item) pairs).
    x = jax.random.normal(k_x, (B, D), dtype=jnp.float32)

    # --- glue: external condition functions and predictors (deterministic) ---
    # TODO(synk): the real module calls arbitrary Python condition fns / predictor.predict_batch;
    #             simulated here as fixed linear+nonlinearity maps emitted directly in the
    #             batch-on-last-axis layout the kernel consumes.
    cond_proj = jax.random.normal(k_cond, (D, K), dtype=jnp.float32) * 0.1
    pred_proj = jax.random.normal(k_pred, (D, P), dtype=jnp.float32) * 0.1
    cond_kb = jax.nn.sigmoid(cond_proj.T @ x.T)     # (K, B) condition values
    preds_pb = jnp.tanh(pred_proj.T @ x.T)          # (P, B) predictor outputs

    # --- FeatureWeightFunction parameters (one weight vector + bias per predictor) ---
    fw_weight = jax.random.normal(k_w, (P, K), dtype=jnp.float32) * 0.5   # (P, K)
    fw_bias = jax.random.normal(k_b, (P,), dtype=jnp.float32) * 0.1       # (P,)

    # --- Pallas kernel: FWLS combination ---
    out = fwls_forward(cond_kb, preds_pb, fw_weight, fw_bias)
    out = jax.block_until_ready(out)

    # Pure-JAX reference of the PyTorch forward (full-precision contraction).
    fw_ref = (
        jnp.einsum("pk,kb->pb", fw_weight, cond_kb, precision=jax.lax.Precision.HIGHEST)
        + fw_bias[:, None]
    )                                               # (P, B)
    ref = jnp.sum(fw_ref * preds_pb, axis=0)        # (B,)

    assert out.shape == (B,)
    assert jnp.allclose(out, ref, atol=1e-5, rtol=1e-5), (out, ref)
    print("KERNEL_OK")
</pallas_src>

<mosaic_0001>
module attributes {stable_mosaic.version = 11 : i64} {
  func.func @fwls_kernel(%arg0: i32, %arg1: memref<4x8xf32, #tpu.memory_space<smem>>, %arg2: memref<4xf32, #tpu.memory_space<smem>>, %arg3: memref<8x8x128xf32, #tpu.memory_space<vmem>>, %arg4: memref<4x8x128xf32, #tpu.memory_space<vmem>>, %arg5: memref<8x128xf32, #tpu.memory_space<vmem>>) attributes {dimension_semantics = [#tpu.dimension_semantics<parallel>], iteration_bounds = array<i64: 3>, scalar_prefetch = 0 : i64, scratch_operands = 0 : i64, tpu.core_type = #tpu.core_type<tc>, window_params = [{transform_indices = @transform_0, window_bounds = array<i64: 4, 8>}, {transform_indices = @transform_1, window_bounds = array<i64: 4>}, {transform_indices = @transform_2, window_bounds = array<i64: 8, 8, 128>}, {transform_indices = @transform_3, window_bounds = array<i64: 4, 8, 128>}, {transform_indices = @transform_4, window_bounds = array<i64: 8, 128>}]} {
    %c0 = arith.constant 0 : index
    %c0_0 = arith.constant 0 : index
    %c0_1 = arith.constant 0 : index
    %0 = vector.load %arg3[%c0, %c0_0, %c0_1] : memref<8x8x128xf32, #tpu.memory_space<vmem>>, vector<8x8x128xf32>
    %c0_2 = arith.constant 0 : index
    %c0_3 = arith.constant 0 : index
    %c0_4 = arith.constant 0 : index
    %1 = vector.load %arg4[%c0_2, %c0_3, %c0_4] : memref<4x8x128xf32, #tpu.memory_space<vmem>>, vector<4x8x128xf32>
    %c0_5 = arith.constant 0 : index
    %c0_6 = arith.constant 0 : index
    %2 = memref.load %arg1[%c0_5, %c0_6] : memref<4x8xf32, #tpu.memory_space<smem>>
    %3 = vector.extract_strided_slice %0 {offsets = [0, 0, 0], sizes = [1, 8, 128], strides = [1, 1, 1]} : vector<8x8x128xf32> to vector<1x8x128xf32>
    %4 = vector.shape_cast %3 : vector<1x8x128xf32> to vector<8x128xf32>
    %5 = vector.broadcast %2 : f32 to vector<8x128xf32>
    %6 = arith.mulf %5, %4 : vector<8x128xf32>
    %c0_7 = arith.constant 0 : index
    %c1 = arith.constant 1 : index
    %7 = memref.load %arg1[%c0_7, %c1] : memref<4x8xf32, #tpu.memory_space<smem>>
    %8 = vector.extract_strided_slice %0 {offsets = [1, 0, 0], sizes = [1, 8, 128], strides = [1, 1, 1]} : vector<8x8x128xf32> to vector<1x8x128xf32>
    %9 = vector.shape_cast %8 : vector<1x8x128xf32> to vector<8x128xf32>
    %10 = vector.broadcast %7 : f32 to vector<8x128xf32>
    %11 = arith.mulf %10, %9 : vector<8x128xf32>
    %12 = arith.addf %6, %11 : vector<8x128xf32>
    %c0_8 = arith.constant 0 : index
    %c2 = arith.constant 2 : index
    %13 = memref.load %arg1[%c0_8, %c2] : memref<4x8xf32, #tpu.memory_space<smem>>
    %14 = vector.extract_strided_slice %0 {offsets = [2, 0, 0], sizes = [1, 8, 128], strides = [1, 1, 1]} : vector<8x8x128xf32> to vector<1x8x128xf32>
    %15 = vector.shape_cast %14 : vector<1x8x128xf32> to vector<8x128xf32>
    %16 = vector.broadcast %13 : f32 to vector<8x128xf32>
    %17 = arith.mulf %16, %15 : vector<8x128xf32>
    %18 = arith.addf %12, %17 : vector<8x128xf32>
    %c0_9 = arith.constant 0 : index
    %c3 = arith.constant 3 : index
    %19 = memref.load %arg1[%c0_9, %c3] : memref<4x8xf32, #tpu.memory_space<smem>>
    %20 = vector.extract_strided_slice %0 {offsets = [3, 0, 0], sizes = [1, 8, 128], strides = [1, 1, 1]} : vector<8x8x128xf32> to vector<1x8x128xf32>
    %21 = vector.shape_cast %20 : vector<1x8x128xf32> to vector<8x128xf32>
    %22 = vector.broadcast %19 : f32 to vector<8x128xf32>
    %23 = arith.mulf %22, %21 : vector<8x128xf32>
    %24 = arith.addf %18, %23 : vector<8x128xf32>
    %c0_10 = arith.constant 0 : index
    %c4 = arith.constant 4 : index
    %25 = memref.load %arg1[%c0_10, %c4] : memref<4x8xf32, #tpu.memory_space<smem>>
    %26 = vector.extract_strided_slice %0 {offsets = [4, 0, 0], sizes = [1, 8, 128], strides = [1, 1, 1]} : vector<8x8x128xf32> to vector<1x8x128xf32>
    %27 = vector.shape_cast %26 : vector<1x8x128xf32> to vector<8x128xf32>
    %28 = vector.broadcast %25 : f32 to vector<8x128xf32>
    %29 = arith.mulf %28, %27 : vector<8x128xf32>
    %30 = arith.addf %24, %29 : vector<8x128xf32>
    %c0_11 = arith.constant 0 : index
    %c5 = arith.constant 5 : index
    %31 = memref.load %arg1[%c0_11, %c5] : memref<4x8xf32, #tpu.memory_space<smem>>
    %32 = vector.extract_strided_slice %0 {offsets = [5, 0, 0], sizes = [1, 8, 128], strides = [1, 1, 1]} : vector<8x8x128xf32> to vector<1x8x128xf32>
    %33 = vector.shape_cast %32 : vector<1x8x128xf32> to vector<8x128xf32>
    %34 = vector.broadcast %31 : f32 to vector<8x128xf32>
    %35 = arith.mulf %34, %33 : vector<8x128xf32>
    %36 = arith.addf %30, %35 : vector<8x128xf32>
    %c0_12 = arith.constant 0 : index
    %c6 = arith.constant 6 : index
    %37 = memref.load %arg1[%c0_12, %c6] : memref<4x8xf32, #tpu.memory_space<smem>>
    %38 = vector.extract_strided_slice %0 {offsets = [6, 0, 0], sizes = [1, 8, 128], strides = [1, 1, 1]} : vector<8x8x128xf32> to vector<1x8x128xf32>
    %39 = vector.shape_cast %38 : vector<1x8x128xf32> to vector<8x128xf32>
    %40 = vector.broadcast %37 : f32 to vector<8x128xf32>
    %41 = arith.mulf %40, %39 : vector<8x128xf32>
    %42 = arith.addf %36, %41 : vector<8x128xf32>
    %c0_13 = arith.constant 0 : index
    %c7 = arith.constant 7 : index
    %43 = memref.load %arg1[%c0_13, %c7] : memref<4x8xf32, #tpu.memory_space<smem>>
    %44 = vector.extract_strided_slice %0 {offsets = [7, 0, 0], sizes = [1, 8, 128], strides = [1, 1, 1]} : vector<8x8x128xf32> to vector<1x8x128xf32>
    %45 = vector.shape_cast %44 : vector<1x8x128xf32> to vector<8x128xf32>
    %46 = vector.broadcast %43 : f32 to vector<8x128xf32>
    %47 = arith.mulf %46, %45 : vector<8x128xf32>
    %48 = arith.addf %42, %47 : vector<8x128xf32>
    %c0_14 = arith.constant 0 : index
    %49 = memref.load %arg2[%c0_14] : memref<4xf32, #tpu.memory_space<smem>>
    %50 = vector.broadcast %49 : f32 to vector<8x128xf32>
    %51 = arith.addf %48, %50 : vector<8x128xf32>
    %52 = vector.extract_strided_slice %1 {offsets = [0, 0, 0], sizes = [1, 8, 128], strides = [1, 1, 1]} : vector<4x8x128xf32> to vector<1x8x128xf32>
    %53 = vector.shape_cast %52 : vector<1x8x128xf32> to vector<8x128xf32>
    %54 = arith.mulf %51, %53 : vector<8x128xf32>
    %c1_15 = arith.constant 1 : index
    %c0_16 = arith.constant 0 : index
    %55 = memref.load %arg1[%c1_15, %c0_16] : memref<4x8xf32, #tpu.memory_space<smem>>
    %56 = vector.extract_strided_slice %0 {offsets = [0, 0, 0], sizes = [1, 8, 128], strides = [1, 1, 1]} : vector<8x8x128xf32> to vector<1x8x128xf32>
    %57 = vector.shape_cast %56 : vector<1x8x128xf32> to vector<8x128xf32>
    %58 = vector.broadcast %55 : f32 to vector<8x128xf32>
    %59 = arith.mulf %58, %57 : vector<8x128xf32>
    %c1_17 = arith.constant 1 : index
    %c1_18 = arith.constant 1 : index
    %60 = memref.load %arg1[%c1_17, %c1_18] : memref<4x8xf32, #tpu.memory_space<smem>>
    %61 = vector.extract_strided_slice %0 {offsets = [1, 0, 0], sizes = [1, 8, 128], strides = [1, 1, 1]} : vector<8x8x128xf32> to vector<1x8x128xf32>
    %62 = vector.shape_cast %61 : vector<1x8x128xf32> to vector<8x128xf32>
    %63 = vector.broadcast %60 : f32 to vector<8x128xf32>
    %64 = arith.mulf %63, %62 : vector<8x128xf32>
    %65 = arith.addf %59, %64 : vector<8x128xf32>
    %c1_19 = arith.constant 1 : index
    %c2_20 = arith.constant 2 : index
    %66 = memref.load %arg1[%c1_19, %c2_20] : memref<4x8xf32, #tpu.memory_space<smem>>
    %67 = vector.extract_strided_slice %0 {offsets = [2, 0, 0], sizes = [1, 8, 128], strides = [1, 1, 1]} : vector<8x8x128xf32> to vector<1x8x128xf32>
    %68 = vector.shape_cast %67 : vector<1x8x128xf32> to vector<8x128xf32>
    %69 = vector.broadcast %66 : f32 to vector<8x128xf32>
    %70 = arith.mulf %69, %68 : vector<8x128xf32>
    %71 = arith.addf %65, %70 : vector<8x128xf32>
    %c1_21 = arith.constant 1 : index
    %c3_22 = arith.constant 3 : index
    %72 = memref.load %arg1[%c1_21, %c3_22] : memref<4x8xf32, #tpu.memory_space<smem>>
    %73 = vector.extract_strided_slice %0 {offsets = [3, 0, 0], sizes = [1, 8, 128], strides = [1, 1, 1]} : vector<8x8x128xf32> to vector<1x8x128xf32>
    %74 = vector.shape_cast %73 : vector<1x8x128xf32> to vector<8x128xf32>
    %75 = vector.broadcast %72 : f32 to vector<8x128xf32>
    %76 = arith.mulf %75, %74 : vector<8x128xf32>
    %77 = arith.addf %71, %76 : vector<8x128xf32>
    %c1_23 = arith.constant 1 : index
    %c4_24 = arith.constant 4 : index
    %78 = memref.load %arg1[%c1_23, %c4_24] : memref<4x8xf32, #tpu.memory_space<smem>>
    %79 = vector.extract_strided_slice %0 {offsets = [4, 0, 0], sizes = [1, 8, 128], strides = [1, 1, 1]} : vector<8x8x128xf32> to vector<1x8x128xf32>
    %80 = vector.shape_cast %79 : vector<1x8x128xf32> to vector<8x128xf32>
    %81 = vector.broadcast %78 : f32 to vector<8x128xf32>
    %82 = arith.mulf %81, %80 : vector<8x128xf32>
    %83 = arith.addf %77, %82 : vector<8x128xf32>
    %c1_25 = arith.constant 1 : index
    %c5_26 = arith.constant 5 : index
    %84 = memref.load %arg1[%c1_25, %c5_26] : memref<4x8xf32, #tpu.memory_space<smem>>
    %85 = vector.extract_strided_slice %0 {offsets = [5, 0, 0], sizes = [1, 8, 128], strides = [1, 1, 1]} : vector<8x8x128xf32> to vector<1x8x128xf32>
    %86 = vector.shape_cast %85 : vector<1x8x128xf32> to vector<8x128xf32>
    %87 = vector.broadcast %84 : f32 to vector<8x128xf32>
    %88 = arith.mulf %87, %86 : vector<8x128xf32>
    %89 = arith.addf %83, %88 : vector<8x128xf32>
    %c1_27 = arith.constant 1 : index
    %c6_28 = arith.constant 6 : index
    %90 = memref.load %arg1[%c1_27, %c6_28] : memref<4x8xf32, #tpu.memory_space<smem>>
    %91 = vector.extract_strided_slice %0 {offsets = [6, 0, 0], sizes = [1, 8, 128], strides = [1, 1, 1]} : vector<8x8x128xf32> to vector<1x8x128xf32>
    %92 = vector.shape_cast %91 : vector<1x8x128xf32> to vector<8x128xf32>
    %93 = vector.broadcast %90 : f32 to vector<8x128xf32>
    %94 = arith.mulf %93, %92 : vector<8x128xf32>
    %95 = arith.addf %89, %94 : vector<8x128xf32>
    %c1_29 = arith.constant 1 : index
    %c7_30 = arith.constant 7 : index
    %96 = memref.load %arg1[%c1_29, %c7_30] : memref<4x8xf32, #tpu.memory_space<smem>>
    %97 = vector.extract_strided_slice %0 {offsets = [7, 0, 0], sizes = [1, 8, 128], strides = [1, 1, 1]} : vector<8x8x128xf32> to vector<1x8x128xf32>
    %98 = vector.shape_cast %97 : vector<1x8x128xf32> to vector<8x128xf32>
    %99 = vector.broadcast %96 : f32 to vector<8x128xf32>
    %100 = arith.mulf %99, %98 : vector<8x128xf32>
    %101 = arith.addf %95, %100 : vector<8x128xf32>
    %c1_31 = arith.constant 1 : index
    %102 = memref.load %arg2[%c1_31] : memref<4xf32, #tpu.memory_space<smem>>
    %103 = vector.broadcast %102 : f32 to vector<8x128xf32>
    %104 = arith.addf %101, %103 : vector<8x128xf32>
    %105 = vector.extract_strided_slice %1 {offsets = [1, 0, 0], sizes = [1, 8, 128], strides = [1, 1, 1]} : vector<4x8x128xf32> to vector<1x8x128xf32>
    %106 = vector.shape_cast %105 : vector<1x8x128xf32> to vector<8x128xf32>
    %107 = arith.mulf %104, %106 : vector<8x128xf32>
    %108 = arith.addf %54, %107 : vector<8x128xf32>
    %c2_32 = arith.constant 2 : index
    %c0_33 = arith.constant 0 : index
    %109 = memref.load %arg1[%c2_32, %c0_33] : memref<4x8xf32, #tpu.memory_space<smem>>
    %110 = vector.extract_strided_slice %0 {offsets = [0, 0, 0], sizes = [1, 8, 128], strides = [1, 1, 1]} : vector<8x8x128xf32> to vector<1x8x128xf32>
    %111 = vector.shape_cast %110 : vector<1x8x128xf32> to vector<8x128xf32>
    %112 = vector.broadcast %109 : f32 to vector<8x128xf32>
    %113 = arith.mulf %112, %111 : vector<8x128xf32>
    %c2_34 = arith.constant 2 : index
    %c1_35 = arith.constant 1 : index
    %114 = memref.load %arg1[%c2_34, %c1_35] : memref<4x8xf32, #tpu.memory_space<smem>>
    %115 = vector.extract_strided_slice %0 {offsets = [1, 0, 0], sizes = [1, 8, 128], strides = [1, 1, 1]} : vector<8x8x128xf32> to vector<1x8x128xf32>
    %116 = vector.shape_cast %115 : vector<1x8x128xf32> to vector<8x128xf32>
    %117 = vector.broadcast %114 : f32 to vector<8x128xf32>
    %118 = arith.mulf %117, %116 : vector<8x128xf32>
    %119 = arith.addf %113, %118 : vector<8x128xf32>
    %c2_36 = arith.constant 2 : index
    %c2_37 = arith.constant 2 : index
    %120 = memref.load %arg1[%c2_36, %c2_37] : memref<4x8xf32, #tpu.memory_space<smem>>
    %121 = vector.extract_strided_slice %0 {offsets = [2, 0, 0], sizes = [1, 8, 128], strides = [1, 1, 1]} : vector<8x8x128xf32> to vector<1x8x128xf32>
    %122 = vector.shape_cast %121 : vector<1x8x128xf32> to vector<8x128xf32>
    %123 = vector.broadcast %120 : f32 to vector<8x128xf32>
    %124 = arith.mulf %123, %122 : vector<8x128xf32>
    %125 = arith.addf %119, %124 : vector<8x128xf32>
    %c2_38 = arith.constant 2 : index
    %c3_39 = arith.constant 3 : index
    %126 = memref.load %arg1[%c2_38, %c3_39] : memref<4x8xf32, #tpu.memory_space<smem>>
    %127 = vector.extract_strided_slice %0 {offsets = [3, 0, 0], sizes = [1, 8, 128], strides = [1, 1, 1]} : vector<8x8x128xf32> to vector<1x8x128xf32>
    %128 = vector.shape_cast %127 : vector<1x8x128xf32> to vector<8x128xf32>
    %129 = vector.broadcast %126 : f32 to vector<8x128xf32>
    %130 = arith.mulf %129, %128 : vector<8x128xf32>
    %131 = arith.addf %125, %130 : vector<8x128xf32>
    %c2_40 = arith.constant 2 : index
    %c4_41 = arith.constant 4 : index
    %132 = memref.load %arg1[%c2_40, %c4_41] : memref<4x8xf32, #tpu.memory_space<smem>>
    %133 = vector.extract_strided_slice %0 {offsets = [4, 0, 0], sizes = [1, 8, 128], strides = [1, 1, 1]} : vector<8x8x128xf32> to vector<1x8x128xf32>
    %134 = vector.shape_cast %133 : vector<1x8x128xf32> to vector<8x128xf32>
    %135 = vector.broadcast %132 : f32 to vector<8x128xf32>
    %136 = arith.mulf %135, %134 : vector<8x128xf32>
    %137 = arith.addf %131, %136 : vector<8x128xf32>
    %c2_42 = arith.constant 2 : index
    %c5_43 = arith.constant 5 : index
    %138 = memref.load %arg1[%c2_42, %c5_43] : memref<4x8xf32, #tpu.memory_space<smem>>
    %139 = vector.extract_strided_slice %0 {offsets = [5, 0, 0], sizes = [1, 8, 128], strides = [1, 1, 1]} : vector<8x8x128xf32> to vector<1x8x128xf32>
    %140 = vector.shape_cast %139 : vector<1x8x128xf32> to vector<8x128xf32>
    %141 = vector.broadcast %138 : f32 to vector<8x128xf32>
    %142 = arith.mulf %141, %140 : vector<8x128xf32>
    %143 = arith.addf %137, %142 : vector<8x128xf32>
    %c2_44 = arith.constant 2 : index
    %c6_45 = arith.constant 6 : index
    %144 = memref.load %arg1[%c2_44, %c6_45] : memref<4x8xf32, #tpu.memory_space<smem>>
    %145 = vector.extract_strided_slice %0 {offsets = [6, 0, 0], sizes = [1, 8, 128], strides = [1, 1, 1]} : vector<8x8x128xf32> to vector<1x8x128xf32>
    %146 = vector.shape_cast %145 : vector<1x8x128xf32> to vector<8x128xf32>
    %147 = vector.broadcast %144 : f32 to vector<8x128xf32>
    %148 = arith.mulf %147, %146 : vector<8x128xf32>
    %149 = arith.addf %143, %148 : vector<8x128xf32>
    %c2_46 = arith.constant 2 : index
    %c7_47 = arith.constant 7 : index
    %150 = memref.load %arg1[%c2_46, %c7_47] : memref<4x8xf32, #tpu.memory_space<smem>>
    %151 = vector.extract_strided_slice %0 {offsets = [7, 0, 0], sizes = [1, 8, 128], strides = [1, 1, 1]} : vector<8x8x128xf32> to vector<1x8x128xf32>
    %152 = vector.shape_cast %151 : vector<1x8x128xf32> to vector<8x128xf32>
    %153 = vector.broadcast %150 : f32 to vector<8x128xf32>
    %154 = arith.mulf %153, %152 : vector<8x128xf32>
    %155 = arith.addf %149, %154 : vector<8x128xf32>
    %c2_48 = arith.constant 2 : index
    %156 = memref.load %arg2[%c2_48] : memref<4xf32, #tpu.memory_space<smem>>
    %157 = vector.broadcast %156 : f32 to vector<8x128xf32>
    %158 = arith.addf %155, %157 : vector<8x128xf32>
    %159 = vector.extract_strided_slice %1 {offsets = [2, 0, 0], sizes = [1, 8, 128], strides = [1, 1, 1]} : vector<4x8x128xf32> to vector<1x8x128xf32>
    %160 = vector.shape_cast %159 : vector<1x8x128xf32> to vector<8x128xf32>
    %161 = arith.mulf %158, %160 : vector<8x128xf32>
    %162 = arith.addf %108, %161 : vector<8x128xf32>
    %c3_49 = arith.constant 3 : index
    %c0_50 = arith.constant 0 : index
    %163 = memref.load %arg1[%c3_49, %c0_50] : memref<4x8xf32, #tpu.memory_space<smem>>
    %164 = vector.extract_strided_slice %0 {offsets = [0, 0, 0], sizes = [1, 8, 128], strides = [1, 1, 1]} : vector<8x8x128xf32> to vector<1x8x128xf32>
    %165 = vector.shape_cast %164 : vector<1x8x128xf32> to vector<8x128xf32>
    %166 = vector.broadcast %163 : f32 to vector<8x128xf32>
    %167 = arith.mulf %166, %165 : vector<8x128xf32>
    %c3_51 = arith.constant 3 : index
    %c1_52 = arith.constant 1 : index
    %168 = memref.load %arg1[%c3_51, %c1_52] : memref<4x8xf32, #tpu.memory_space<smem>>
    %169 = vector.extract_strided_slice %0 {offsets = [1, 0, 0], sizes = [1, 8, 128], strides = [1, 1, 1]} : vector<8x8x128xf32> to vector<1x8x128xf32>
    %170 = vector.shape_cast %169 : vector<1x8x128xf32> to vector<8x128xf32>
    %171 = vector.broadcast %168 : f32 to vector<8x128xf32>
    %172 = arith.mulf %171, %170 : vector<8x128xf32>
    %173 = arith.addf %167, %172 : vector<8x128xf32>
    %c3_53 = arith.constant 3 : index
    %c2_54 = arith.constant 2 : index
    %174 = memref.load %arg1[%c3_53, %c2_54] : memref<4x8xf32, #tpu.memory_space<smem>>
    %175 = vector.extract_strided_slice %0 {offsets = [2, 0, 0], sizes = [1, 8, 128], strides = [1, 1, 1]} : vector<8x8x128xf32> to vector<1x8x128xf32>
    %176 = vector.shape_cast %175 : vector<1x8x128xf32> to vector<8x128xf32>
    %177 = vector.broadcast %174 : f32 to vector<8x128xf32>
    %178 = arith.mulf %177, %176 : vector<8x128xf32>
    %179 = arith.addf %173, %178 : vector<8x128xf32>
    %c3_55 = arith.constant 3 : index
    %c3_56 = arith.constant 3 : index
    %180 = memref.load %arg1[%c3_55, %c3_56] : memref<4x8xf32, #tpu.memory_space<smem>>
    %181 = vector.extract_strided_slice %0 {offsets = [3, 0, 0], sizes = [1, 8, 128], strides = [1, 1, 1]} : vector<8x8x128xf32> to vector<1x8x128xf32>
    %182 = vector.shape_cast %181 : vector<1x8x128xf32> to vector<8x128xf32>
    %183 = vector.broadcast %180 : f32 to vector<8x128xf32>
    %184 = arith.mulf %183, %182 : vector<8x128xf32>
    %185 = arith.addf %179, %184 : vector<8x128xf32>
    %c3_57 = arith.constant 3 : index
    %c4_58 = arith.constant 4 : index
    %186 = memref.load %arg1[%c3_57, %c4_58] : memref<4x8xf32, #tpu.memory_space<smem>>
    %187 = vector.extract_strided_slice %0 {offsets = [4, 0, 0], sizes = [1, 8, 128], strides = [1, 1, 1]} : vector<8x8x128xf32> to vector<1x8x128xf32>
    %188 = vector.shape_cast %187 : vector<1x8x128xf32> to vector<8x128xf32>
    %189 = vector.broadcast %186 : f32 to vector<8x128xf32>
    %190 = arith.mulf %189, %188 : vector<8x128xf32>
    %191 = arith.addf %185, %190 : vector<8x128xf32>
    %c3_59 = arith.constant 3 : index
    %c5_60 = arith.constant 5 : index
    %192 = memref.load %arg1[%c3_59, %c5_60] : memref<4x8xf32, #tpu.memory_space<smem>>
    %193 = vector.extract_strided_slice %0 {offsets = [5, 0, 0], sizes = [1, 8, 128], strides = [1, 1, 1]} : vector<8x8x128xf32> to vector<1x8x128xf32>
    %194 = vector.shape_cast %193 : vector<1x8x128xf32> to vector<8x128xf32>
    %195 = vector.broadcast %192 : f32 to vector<8x128xf32>
    %196 = arith.mulf %195, %194 : vector<8x128xf32>
    %197 = arith.addf %191, %196 : vector<8x128xf32>
    %c3_61 = arith.constant 3 : index
    %c6_62 = arith.constant 6 : index
    %198 = memref.load %arg1[%c3_61, %c6_62] : memref<4x8xf32, #tpu.memory_space<smem>>
    %199 = vector.extract_strided_slice %0 {offsets = [6, 0, 0], sizes = [1, 8, 128], strides = [1, 1, 1]} : vector<8x8x128xf32> to vector<1x8x128xf32>
    %200 = vector.shape_cast %199 : vector<1x8x128xf32> to vector<8x128xf32>
    %201 = vector.broadcast %198 : f32 to vector<8x128xf32>
    %202 = arith.mulf %201, %200 : vector<8x128xf32>
    %203 = arith.addf %197, %202 : vector<8x128xf32>
    %c3_63 = arith.constant 3 : index
    %c7_64 = arith.constant 7 : index
    %204 = memref.load %arg1[%c3_63, %c7_64] : memref<4x8xf32, #tpu.memory_space<smem>>
    %205 = vector.extract_strided_slice %0 {offsets = [7, 0, 0], sizes = [1, 8, 128], strides = [1, 1, 1]} : vector<8x8x128xf32> to vector<1x8x128xf32>
    %206 = vector.shape_cast %205 : vector<1x8x128xf32> to vector<8x128xf32>
    %207 = vector.broadcast %204 : f32 to vector<8x128xf32>
    %208 = arith.mulf %207, %206 : vector<8x128xf32>
    %209 = arith.addf %203, %208 : vector<8x128xf32>
    %c3_65 = arith.constant 3 : index
    %210 = memref.load %arg2[%c3_65] : memref<4xf32, #tpu.memory_space<smem>>
    %211 = vector.broadcast %210 : f32 to vector<8x128xf32>
    %212 = arith.addf %209, %211 : vector<8x128xf32>
    %213 = vector.extract_strided_slice %1 {offsets = [3, 0, 0], sizes = [1, 8, 128], strides = [1, 1, 1]} : vector<4x8x128xf32> to vector<1x8x128xf32>
    %214 = vector.shape_cast %213 : vector<1x8x128xf32> to vector<8x128xf32>
    %215 = arith.mulf %212, %214 : vector<8x128xf32>
    %216 = arith.addf %162, %215 : vector<8x128xf32>
    %c0_66 = arith.constant 0 : index
    %c0_67 = arith.constant 0 : index
    %217 = vector.load %arg5[%c0_66, %c0_67] : memref<8x128xf32, #tpu.memory_space<vmem>>, vector<8x128xf32>
    tpu.vector_store %arg5[%c0_66, %c0_67], %216 {strides = array<i32>} : memref<8x128xf32, #tpu.memory_space<vmem>>, vector<8x128xf32>,
    return
  }
  func.func @transform_0(%arg0: i32) -> (i32, i32) {
    %c0_i32 = arith.constant 0 : i32
    %c0_i32_0 = arith.constant 0 : i32
    %c0_i32_1 = arith.constant 0 : i32
    return %c0_i32, %c0_i32_0 : i32, i32
  }
  func.func @transform_1(%arg0: i32) -> i32 {
    %c0_i32 = arith.constant 0 : i32
    %c0_i32_0 = arith.constant 0 : i32
    return %c0_i32 : i32
  }
  func.func @transform_2(%arg0: i32) -> (i32, i32, i32) {
    %c0_i32 = arith.constant 0 : i32
    %c0_i32_0 = arith.constant 0 : i32
    %c0_i32_1 = arith.constant 0 : i32
    return %c0_i32, %arg0, %c0_i32_0 : i32, i32, i32
  }
  func.func @transform_3(%arg0: i32) -> (i32, i32, i32) {
    %c0_i32 = arith.constant 0 : i32
    %c0_i32_0 = arith.constant 0 : i32
    %c0_i32_1 = arith.constant 0 : i32
    return %c0_i32, %arg0, %c0_i32_0 : i32, i32, i32
  }
  func.func @transform_4(%arg0: i32) -> (i32, i32) {
    %c0_i32 = arith.constant 0 : i32
    %c0_i32_0 = arith.constant 0 : i32
    return %arg0, %c0_i32 : i32, i32
  }
}

</mosaic_0001>

<bundles_post_ra>
// kernel: tpu_custom_call.1
= control target key start
LH: loop header
LB: loop body
LE: loop exit
PB: predicated region body
PF: predicated region fallthrough
CT: control target
= control target key end

     0   :  { %s1309_s0 = inlined_call_operand.hbm [shape: f32[4,8], index: 0, kind: input, shape index: {}]   ;;  %s1310_s1 = inlined_call_operand.vmem [shape: f32[4], index: 1, kind: input, shape index: {}]   ;;  %s1311_s2 = inlined_call_operand.hbm [shape: f32[8,24,128], index: 2, kind: input, shape index: {}]   ;;  %s1312_s3 = inlined_call_operand.hbm [shape: f32[4,24,128], index: 3, kind: input, shape index: {}]   ;;  %s1313_s4 = inlined_call_operand.hbm [shape: f32[24,128], index: 4, kind: output, shape index: {}]  }
   0x1   :  { %1317 = sst [smem:[#allocation17_spill]] %s1309_s0 }
   0x2   :  { %1318 = sst [smem:[#allocation18_spill]] %s1310_s1 }
   0x3   :  { %1319 = sst [smem:[#allocation19_spill]] %s1311_s2 }
   0x4   :  { %9 = vsyncpa [#allocation5], 0 }
   0x5   :  { %10 = vsyncpa [#allocation6], 0 }
   0x6   :  { %11 = vsyncpa [#allocation3], 0 }
   0x7   :  { %13 = vsyncpa [#allocation3 + $0x1], 0 }
   0x8   :  { %14 = vsyncpa [#allocation10], 0 }
   0x9   :  { %16 = vsyncpa [#allocation10 + $0x1], 0 }
   0xa   :  { %17 = vsyncpa [#allocation4], 0 }
   0xb   :  { %19 = vsyncpa [#allocation4 + $0x1], 0  ;;  %s895_s15 = smov 0   ;;  %s897_s16 = smov 0  }
   0xc   :  { %s899_s17 = smov 0   ;;  %s901_s18 = smov 0  }
   0xd LB: > { %s916_s19 = sadd.s32 4294967295, %s860_s18   ;;  %s566_s20 = sadd.s32 4294967294, %s860_s18   ;;  %s860_s18 = sphi %s901_s18, %s1340_s18   ;;  %s856_s17 = sphi %s899_s17, %s1339_s17   ;;  %s852_s16 = sphi %s897_s16, %s1338_s16   ;;  %s848_s15 = sphi %s895_s15, %s1337_s15  }
   0xe   : > { %s920_s21 = sadd.s32 1, %s860_s18   ;;  %s74_s22 = sadd.s32 1, %s856_s17 }
   0xf   : > { %s71_s23 = ssub.s32 %s860_s18, %s920_s21  ;;  %p81_p0 = scmp.ne.s32.totalorder %s856_s17, %s852_s16 }
  0x10   : > { %p72_p1 = scmp.eq.s32.totalorder %s71_s23, 0  ;;  %p82_p2 = scmp.eq.s32.totalorder %s860_s18, 0 }
  0x11   : > { %p87_p3 = scmp.ne.s32.totalorder %s852_s16, %s848_s15  ;;  %p1314_p4 = scmp.eq.s32.totalorder %s916_s19, 0 }
  0x12   : > { %s932_s24 = scalar_select %p72_p1, %s856_s17, %s74_s22  }
  0x13   : > { %p934_p5 = por %p82_p2, %p81_p0  ;;  %p940_p6 = por %p1314_p4, %p87_p3 }
  0x14   : > { %p137_p7 = scmp.eq.s32.totalorder %s916_s19, 2  ;;  %p143_p8 = scmp.eq.s32.totalorder %s566_s20, 2 }
  0x15   : > { %s1321_s26 = scalar_select %p940_p6, 1, 0 }
  0x16   : > { %p567_p9 = scmp.ge.s32.totalorder %s860_s18, 1  ;;  %p150_p10 = scmp.lt.s32.totalorder %s860_s18, 4 }
  0x17   : > { %p947_p11 = por %p137_p7, %p81_p0  ;;  %p951_p12 = por %p143_p8, %p87_p3 }
  0x18   : > { %p955_p13 = pnand %p567_p9, %p150_p10  ;;  %p653_p2 = scmp.lt.s32.totalorder %s860_s18, 3 }
  0x19   : > { %s1322_s27 = scalar_select %p947_p11, 1, 0 }
  0x1a   : > { %s1323_s28 = scalar_select %p951_p12, 1, 0 }
  0x1b   : > { %p633_p1 = pneg %p955_p13  ;;  %s1325_s1 = sld [smem:[#allocation18_spill]] }
  0x1c   : > { %p973_p3 = pnand %p653_p2, %p934_p5  ;;  %s978_s9 = sand.u32 1, %s856_s17  }
  0x1d   : > { %p967_p0 = pnand %p633_p1, %p1314_p4  ;;  %s1328_s0 = sld [smem:[#allocation17_spill]] }
  0x1f   : > { %p696_p8 = pneg %p967_p0 }
  0x21   : > { %s172_s6 = sshll.u32 %s1325_s1, 4  ;;  %s173_s6 = int_to_ptr.vmem [resolvable:$true] %s172_s6 }
  0x23   : > { %s694_s12 = scalar_lea.hbm %s1328_s0, 64 }
  0x24   : > { %p695_p7 = scmp.ne.s32.totalorder %s1328_s0, %s694_s12  ;;  %p701_p5 = scmp.lt.u32.totalorder %s694_s12, %s1328_s0 }
  0x26   : > { %p697_p9 = pnand %p696_p8, %p695_p7 }
  0x28   : > { %p698_p10 = pneg %p697_p9 }
  0x2a   : > { %p703_p1 = pnand %p701_p5, %p698_p10 }
  0x2c   : > { %706 = shalt.err (!%p703_p1)
}
  0x2d   : > { %s862_s23 = smov [#allocation2]   ;;  %s707_s5 = scalar_lea.vmem %s173_s6, 16 }
  0x2e   : > { %636 = dma.hbm_to_smem (!%p967_p0), %s1328_s0, 64, %s862_s23, [#allocation5]  }
  0x2f   : > { %p708_p2 = scmp.ne.s32.totalorder %s173_s6, %s707_s5  ;;  %p715_p11 = scmp.lt.s32.totalorder %s173_s6, %s173_s6 }
  0x30   : > { %p716_p7 = scmp.lt.s32.totalorder %s707_s5, %s707_s5 }
  0x31   : > { %p710_p4 = pnand %p708_p2, %p696_p8 }
  0x32   : > { %p717_p9 = por %p716_p7, %p715_p11 }
  0x33   : > { %p711_p12 = pneg %p710_p4 }
  0x35   : > { %p718_p6 = pnand %p717_p9, %p711_p12 }
  0x37   : > { %721 = shalt.err (!%p718_p6)
}
  0x38   : > { %s863_s10 = smov [#allocation7]   ;;  %s571_s11 = sshll.u32 %s978_s9, 6 }
  0x39   : > { %639 = dma.vmem_to_smem (!%p967_p0), %s173_s6, 16, %s863_s10, [#allocation6]  }
  0x3a   : > { %s572_s12 = sshll.u32 %s860_s18, 7  ;;  %s1329_s2 = sld [smem:[#allocation19_spill]] }
  0x3b   : > { %s187_s7 = scalar_lea.vmem [#allocation8], %s571_s11  ;;  %s184_s23 = scalar_lea.sflag [#allocation3], %s978_s9 }
  0x3c   : > { %s193_s22 = sshll.u32 %s187_s7, 4  ;;  %p724_p6 = pneg %p973_p3  ;;  %s1007_s22 = int_to_ptr.vmem [resolvable:$true] %s193_s22 }
  0x40   : > { %s1005_s20 = scalar_lea.hbm %s1329_s2, %s572_s12  ;;  %s727_s5 = scalar_lea.hbm %s1329_s2, 3072 }
  0x41   : > { %s722_s25 = scalar_lea.hbm %s1005_s20, 1024  ;;  %p728_p0 = scmp.lt.u32.totalorder %s1005_s20, %s1329_s2 }
  0x42   : > { %p723_p4 = scmp.ne.s32.totalorder %s1005_s20, %s722_s25  ;;  %p729_p8 = scmp.lt.u32.totalorder %s727_s5, %s722_s25 }
  0x43   : > { %p731_p5 = scmp.lt.u32.totalorder %s722_s25, %s1005_s20 }
  0x44   : > { %p725_p11 = pnand %p724_p6, %p723_p4  ;;  %p730_p10 = por %p729_p8, %p728_p0 }
  0x46   : > { %p726_p12 = pneg %p725_p11  ;;  %p732_p1 = por %p731_p5, %p730_p10 }
  0x48   : > { %p733_p2 = pnand %p732_p1, %p726_p12 }
  0x4a   : > { %736 = shalt.err (!%p733_p2)
}
  0x4b   : > { %s737_s11 = scalar_lea.vmem %s1007_s22, 1024  ;;  %s864_s14 = smov [#allocation8]  }
  0x4c   : > { %p738_p7 = scmp.ne.s32.totalorder %s1007_s22, %s737_s11  ;;  %s742_s7 = sshll.u32 %s864_s14, 4  ;;  %s743_s7 = int_to_ptr.vmem [resolvable:$false] %s742_s7 }
  0x4d   : > { %s744_s6 = scalar_lea.vmem %s743_s7, 2048  ;;  %p745_p11 = scmp.lt.s32.totalorder %s1007_s22, %s743_s7 }
  0x4e   : > { %p740_p9 = pnand %p738_p7, %p724_p6  ;;  %p746_p0 = scmp.lt.s32.totalorder %s744_s6, %s737_s11 }
  0x50   : > { %p741_p4 = pneg %p740_p9  ;;  %p747_p8 = por %p746_p0, %p745_p11 }
  0x52   : > { %p748_p10 = pnand %p747_p8, %p741_p4 }
  0x54   : > { %751 = shalt.err (!%p748_p10)
}
  0x55   : > { %s865_s25 = smov 384   ;;  %s866_s30 = smov 128  }
  0x56   : > { %s867_s5 = smov 8   ;;  %s573_s10 = sshll.u32 %s978_s9, 5 }
  0x57   : > { %643 = dma.hbm_to_vmem [thread:$0]  (!%p973_p3), %s1005_s20, 1024, %s1007_s22, %s184_s23, %s865_s25, %s866_s30, %s867_s5  }
  0x58   : > { %s1046_s14 = scalar_lea.hbm %s1312_s3, %s572_s12  ;;  %s207_s7 = scalar_lea.vmem [#allocation9], %s573_s10 }
  0x59   : > { %s213_s6 = sshll.u32 %s207_s7, 4  ;;  %s204_s0 = scalar_lea.sflag [#allocation10], %s978_s9  ;;  %s1048_s6 = int_to_ptr.vmem [resolvable:$true] %s213_s6 }
  0x5a   : > { %s752_s1 = scalar_lea.hbm %s1046_s14, 512  ;;  %s757_s12 = scalar_lea.hbm %s1312_s3, 1536 }
  0x5b   : > { %p753_p12 = scmp.ne.s32.totalorder %s1046_s14, %s752_s1  ;;  %p758_p2 = scmp.lt.u32.totalorder %s1046_s14, %s1312_s3 }
  0x5c   : > { %p759_p7 = scmp.lt.u32.totalorder %s757_s12, %s752_s1  ;;  %p761_p4 = scmp.lt.u32.totalorder %s752_s1, %s1046_s14 }
  0x5d   : > { %p755_p5 = pnand %p753_p12, %p724_p6 }
  0x5e   : > { %p760_p9 = por %p759_p7, %p758_p2 }
  0x5f   : > { %p756_p1 = pneg %p755_p5 }
  0x60   : > { %p762_p11 = por %p761_p4, %p760_p9 }
  0x62   : > { %p763_p0 = pnand %p762_p11, %p756_p1 }
  0x64   : > { %766 = shalt.err (!%p763_p0)
}
  0x65   : > { %s767_s10 = scalar_lea.vmem %s1048_s6, 512  ;;  %s868_s11 = smov [#allocation9]  }
  0x66   : > { %p768_p8 = scmp.ne.s32.totalorder %s1048_s6, %s767_s10  ;;  %s772_s7 = sshll.u32 %s868_s11, 4  ;;  %s773_s7 = int_to_ptr.vmem [resolvable:$false] %s772_s7 }
  0x67   : > { %s774_s20 = scalar_lea.vmem %s773_s7, 1024  ;;  %p775_p5 = scmp.lt.s32.totalorder %s1048_s6, %s773_s7 }
  0x68   : > { %p770_p10 = pnand %p768_p8, %p724_p6  ;;  %p776_p2 = scmp.lt.s32.totalorder %s774_s20, %s767_s10 }
  0x6a   : > { %p771_p12 = pneg %p770_p10  ;;  %p777_p7 = por %p776_p2, %p775_p5 }
  0x6c   : > { %p778_p9 = pnand %p777_p7, %p771_p12 }
  0x6e   : > { %781 = shalt.err (!%p778_p9)
}
  0x6f   : > { %646 = dma.hbm_to_vmem [thread:$0]  (!%p973_p3), %s1046_s14, 512, %s1048_s6, %s204_s0, %s865_s25, %s866_s30, %s867_s5  }
  0x70   : > { %225 = sbr.rel (%p955_p13) target bundleno = 192 (0xc0), region = 36  ;;  %p1330_p6 = scmp.eq.s32.totalorder (!%p955_p13), %s916_s19, 0 }
  0x77   : > { %827 = dma.done.wait (%p1330_p6), [#allocation5], 64   ;;  %p1331_p1 = pmov %p1330_p6 }
  0x79   : > { %829 = vsyncadd (%p1331_p1), [#allocation5], 4294967232  ;;  %p1332_p4 = pmov %p1331_p1 }
  0x7a   : > { %p1333_p11 = pmov %p1331_p1 }
  0x7b   : > { %831 = dma.done.wait (%p1332_p4), [#allocation6], 16  }
  0x7c   : > { %833 = vsyncadd (%p1333_p11), [#allocation6], 4294967280  ;;  %s1090_s1 = sand.u32 1, %s852_s16   ;;  %p1334_p13 = scmp.ne.s32.totalorder %s1321_s26, 0 }
  0x7d   : > { %s578_s0 = sshll.u32 %s1090_s1, 6  ;;  %s236_s29 = scalar_lea.sflag [#allocation3], %s1090_s1 }
  0x7e   : > { %s1094_s8 = scalar_lea.vmem [#allocation8], %s578_s0 }
  0x7f   : > { %835 = dma.done.wait (%p1334_p13), %s236_s29, 1024  }
  0x80   : > { %837 = vsyncadd (%p1334_p13), %s236_s29, 4294966272  ;;  %s579_s9 = sshll.u32 %s1090_s1, 5  ;;  %s245_s25 = scalar_lea.sflag [#allocation10], %s1090_s1 }
  0x81   : > { %s1102_s30 = scalar_lea.vmem [#allocation9], %s579_s9 }
  0x82   : > { %839 = dma.done.wait (%p1334_p13), %s245_s25, 512  }
  0x83   : > { %841 = vsyncadd (%p1334_p13), %s245_s25, 4294966784 }
  0x84   : > { %253 = sfence }
  0x85   : > { %s291_s5 = sld [smem:[#allocation2]]  ;;  %s581_s14 = sld [smem:[#allocation2 + $0x1]]  ;;  %v1109_v0 = vld [vmem:[%s1094_s8] sm:$0xff]  ;;  %v1116_v1 = vld [vmem:[%s1094_s8 + $0x8] sm:$0xff]  ;;  %v1121_v2 = vld [vmem:[%s1094_s8 + $0x10] sm:$0xff] }
  0x86   : > { %s582_s6 = sld [smem:[#allocation2 + $0x2]]  ;;  %s583_s22 = sld [smem:[#allocation2 + $0x3]]  ;;  %v1128_v4 = vld [vmem:[%s1094_s8 + $0x18] sm:$0xff]  ;;  %v1141_v9 = vld [vmem:[%s1094_s8 + $0x20] sm:$0xff]  ;;  %v1144_v10 = vld [vmem:[%s1094_s8 + $0x28] sm:$0xff] }
  0x87   : > { %s1111_s12 = sld [smem:[#allocation2 + $0x4]]  ;;  %s1113_s23 = sld [smem:[#allocation2 + $0x5]]  ;;  %v1173_v24 = vld [vmem:[%s1094_s8 + $0x30] sm:$0xff]  ;;  %v1201_v39 = vld [vmem:[%s1094_s8 + $0x38] sm:$0xff] }
  0x88   : > { %s1118_s26 = sld [smem:[#allocation2 + $0x6]]  ;;  %s1123_s13 = sld [smem:[#allocation2 + $0x7]] }
  0x89   : > { %s1125_s10 = sld [smem:[#allocation2 + $0x80]]  ;;  %s1131_s11 = sld [smem:[#allocation2 + $0x81]] }
  0x8a   : > { %s1133_s7 = sld [smem:[#allocation2 + $0x82]]  ;;  %s1136_s20 = sld [smem:[#allocation2 + $0x83]] }
  0x8b   : > { %v292_v3 = vstv %s291_s5  ;;  %v295_v6 = vstv %s581_s14  ;;  %s1138_s0 = sld [smem:[#allocation2 + $0x84]]  ;;  %s1147_s29 = sld [smem:[#allocation2 + $0x85]] }
  0x8c   : > { %v293_v5 = vmul.f32 %v292_v3, %v1109_v0  ;;  %v296_v7 = vmul.f32 %v295_v6, %v1116_v1  ;;  %v299_v8 = vstv %s582_s6  ;;  %v303_v12 = vstv %s583_s22  ;;  %s1149_s9 = sld [smem:[#allocation2 + $0x86]]  ;;  %s1154_s25 = sld [smem:[#allocation2 + $0x87]] }
  0x8d   : > { %v300_v11 = vmul.f32 %v299_v8, %v1121_v2  ;;  %v304_v14 = vmul.f32 %v303_v12, %v1128_v4  ;;  %v307_v15 = vstv %s1111_s12  ;;  %v311_v16 = vstv %s1113_s23  ;;  %s1156_s5 = sld [smem:[#allocation2 + $0x100]]  ;;  %s1158_s14 = sld [smem:[#allocation2 + $0x101]] }
  0x8e   : > { %v297_v13 = vadd.f32 %v296_v7, %v293_v5  ;;  %v308_v18 = vmul.f32 %v307_v15, %v1141_v9  ;;  %v312_v19 = vmul.f32 %v311_v16, %v1144_v10  ;;  %s1162_s6 = sld [smem:[#allocation2 + $0x102]]  ;;  %s1164_s22 = sld [smem:[#allocation2 + $0x103]]  ;;  %v315_v20 = vstv %s1118_s26 }
  0x8f   : > { %v327_v21 = vstv %s1125_s10  ;;  %v330_v22 = vstv %s1131_s11  ;;  %s1170_s12 = sld [smem:[#allocation2 + $0x104]]  ;;  %s1178_s23 = sld [smem:[#allocation2 + $0x105]]  ;;  %v316_v35 = vmul.f32 %v315_v20, %v1173_v24  ;;  %v319_v36 = vstv %s1123_s13 }
  0x90   : > { %v301_v17 = vadd.f32 %v300_v11, %v297_v13  ;;  %v334_v23 = vstv %s1133_s7  ;;  %v328_v26 = vmul.f32 %v327_v21, %v1109_v0  ;;  %v331_v27 = vmul.f32 %v330_v22, %v1116_v1  ;;  %s1180_s2 = sld [smem:[#allocation7]]  ;;  %s1185_s26 = sld [smem:[#allocation7 + $0x1]] }
  0x91   : > { %v335_v28 = vmul.f32 %v334_v23, %v1121_v2  ;;  %v338_v29 = vstv %s1136_s20  ;;  %v342_v30 = vstv %s1138_s0  ;;  %v346_v31 = vstv %s1147_s29  ;;  %s1188_s10 = sld [smem:[#allocation2 + $0x106]]  ;;  %s1190_s11 = sld [smem:[#allocation2 + $0x180]] }
  0x92   : > { %v305_v25 = vadd.f32 %v304_v14, %v301_v17  ;;  %v332_v33 = vadd.f32 %v331_v27, %v328_v26  ;;  %v339_v34 = vmul.f32 %v338_v29, %v1128_v4  ;;  %v343_v37 = vmul.f32 %v342_v30, %v1141_v9  ;;  %s1196_s7 = sld [smem:[#allocation2 + $0x181]]  ;;  %s1198_s20 = sld [smem:[#allocation2 + $0x182]] }
  0x93   : > { %v350_v38 = vstv %s1149_s9  ;;  %v347_v42 = vmul.f32 %v346_v31, %v1144_v10  ;;  %v363_v43 = vstv %s1156_s5  ;;  %s1205_s0 = sld [smem:[#allocation2 + $0x183]]  ;;  %v366_v45 = vstv %s1158_s14  ;;  %s1211_s13 = sld [smem:[#allocation2 + $0x107]] }
  0x94   : > { %v309_v32 = vadd.f32 %v308_v18, %v305_v25  ;;  %v336_v41 = vadd.f32 %v335_v28, %v332_v33  ;;  %v364_v44 = vmul.f32 %v363_v43, %v1109_v0  ;;  %v370_v46 = vstv %s1162_s6  ;;  %s1216_s8 = sld [smem:[#allocation2 + $0x184]]  ;;  %s1223_s29 = sld [smem:[#allocation2 + $0x185]]  ;;  %v288_v33 = vld [vmem:[%s1102_s30 + $0x8] sm:$0xff] }
  0x95   : > { %v374_v47 = vstv %s1164_s22  ;;  %v354_v49 = vstv %s1154_s25  ;;  %v367_v50 = vmul.f32 %v366_v45, %v1116_v1  ;;  %v371_v51 = vmul.f32 %v370_v46, %v1121_v2  ;;  %s1230_s9 = sld [smem:[#allocation2 + $0x186]]  ;;  %s1233_s25 = sld [smem:[#allocation7 + $0x2]] }
  0x96   : > { %v313_v40 = vadd.f32 %v312_v19, %v309_v32  ;;  %v340_v48 = vadd.f32 %v339_v34, %v336_v41  ;;  %v320_v52 = vmul.f32 %v319_v36, %v1201_v39  ;;  %v351_v53 = vmul.f32 %v350_v38, %v1173_v24  ;;  %v287_v32 = vld [vmem:[%s1102_s30] sm:$0xff]  ;;  %s614_s5 = sld [smem:[#allocation7 + $0x3]]  ;;  %s580_s14 = sshll.u32 %s1090_s1, 3 }
  0x97   : > { %v378_v54 = vstv %s1170_s12  ;;  %v368_v56 = vadd.f32 %v367_v50, %v364_v44  ;;  %v375_v57 = vmul.f32 %v374_v47, %v1128_v4  ;;  %v382_v58 = vstv %s1178_s23  ;;  %s616_s6 = sshll.u32 %s916_s19, 7  ;;  %s278_s22 = scalar_lea.vmem [#allocation11], %s580_s14 }
  0x98   : > { %v344_v55 = vadd.f32 %v343_v37, %v340_v48  ;;  %v317_v59 = vadd.f32 %v316_v35, %v313_v40  ;;  %v323_v60 = vstv %s1180_s2  ;;  %v355_v61 = vmul.f32 %v354_v49, %v1201_v39  ;;  %s1240_s2 = sld [smem:[#allocation2 + $0x187]]  ;;  %s449_s12 = sshll.u32 %s278_s22, 4  ;;  %s1268_s12 = int_to_ptr.vmem [resolvable:$true] %s449_s12 }
  0x99   : > { %v358_v62 = vstv %s1185_s26  ;;  %v372_v3 = vadd.f32 %v371_v51, %v368_v56  ;;  %v379_v5 = vmul.f32 %v378_v54, %v1141_v9  ;;  %v386_v6 = vstv %s1188_s10  ;;  %s1266_s10 = scalar_lea.hbm %s1313_s4, %s616_s6  ;;  %p1335_p0 = scmp.ne.s32.totalorder %s1322_s27, 0 }
  0x9a   : > { %v348_v63 = vadd.f32 %v347_v42, %v344_v55  ;;  %v383_v7 = vmul.f32 %v382_v58, %v1144_v10  ;;  %v399_v8 = vstv %s1190_s11  ;;  %v402_v11 = vstv %s1196_s7  ;;  %s436_s11 = scalar_lea.sflag [#allocation4], %s1090_s1  ;;  %s869_s19 = smov [#allocation11]  }
  0x9b   : > { %v406_v12 = vstv %s1198_s20  ;;  %v376_v14 = vadd.f32 %v375_v57, %v372_v3  ;;  %v400_v15 = vmul.f32 %v399_v8, %v1109_v0  ;;  %v410_v16 = vstv %s1205_s0  ;;  %s786_s7 = sshll.u32 %s869_s19, 4  ;;  %s787_s7 = int_to_ptr.vmem [resolvable:$false] %s786_s7 }
  0x9c   : > { %v352_v13 = vadd.f32 %v351_v53, %v348_v63  ;;  %v321_v17 = vadd.f32 %v320_v52, %v317_v59  ;;  %v390_v18 = vstv %s1211_s13  ;;  %v403_v19 = vmul.f32 %v402_v11, %v1116_v1  ;;  %v290_v52 = vld [vmem:[%s1102_s30 + $0x18] sm:$0xff]  ;;  %s788_s20 = scalar_lea.vmem %s787_s7, 256  ;;  %p789_p12 = scmp.lt.s32.totalorder %s1268_s12, %s787_s7 }
  0x9d   : > { %v407_v20 = vmul.f32 %v406_v12, %v1121_v2  ;;  %v380_v22 = vadd.f32 %v379_v5, %v376_v14  ;;  %v387_v23 = vmul.f32 %v386_v6, %v1173_v24  ;;  %v414_v25 = vstv %s1216_s8 }
  0x9e   : > { %v356_v21 = vadd.f32 %v355_v61, %v352_v13  ;;  %v404_v26 = vadd.f32 %v403_v19, %v400_v15  ;;  %v411_v0 = vmul.f32 %v410_v16, %v1128_v4  ;;  %v391_v28 = vmul.f32 %v390_v18, %v1201_v39 }
  0x9f   : > { %v384_v27 = vadd.f32 %v383_v7, %v380_v22  ;;  %v418_v29 = vstv %s1223_s29  ;;  %v324_v30 = vadd.f32 %v323_v60, %v321_v17  ;;  %v415_v2 = vmul.f32 %v414_v25, %v1141_v9  ;;  %v289_v9 = vld [vmem:[%s1102_s30 + $0x10] sm:$0xff]  ;;  %s782_s30 = scalar_lea.vmem %s1268_s12, 128 }
  0xa0   : > { %v359_v1 = vadd.f32 %v358_v62, %v356_v21  ;;  %v408_v31 = vadd.f32 %v407_v20, %v404_v26  ;;  %v422_v35 = vstv %s1230_s9  ;;  %v394_v36 = vstv %s1233_s25  ;;  %p783_p3 = scmp.ne.s32.totalorder %s1268_s12, %s782_s30  ;;  %p790_p5 = scmp.lt.s32.totalorder %s788_s20, %s782_s30 }
  0xa1   : > { %v388_v34 = vadd.f32 %v387_v23, %v384_v27  ;;  %v419_v4 = vmul.f32 %v418_v29, %v1144_v10  ;;  %v426_v40 = vstv %s1240_s2  ;;  %v325_v41 = vmul.f32 %v324_v30, %v287_v32 }
  0xa2   : > { %v412_v37 = vadd.f32 %v411_v0, %v408_v31  ;;  %v360_v42 = vmul.f32 %v359_v1, %v288_v33  ;;  %v423_v44 = vmul.f32 %v422_v35, %v1173_v24  ;;  %v427_v47 = vmul.f32 %v426_v40, %v1201_v39  ;;  %p784_p8 = pnand %p783_p3, %p1335_p0  ;;  %p791_p2 = por %p790_p5, %p789_p12 }
  0xa3   : > { %v392_v38 = vadd.f32 %v391_v28, %v388_v34  ;;  %v430_v10 = vstv %s614_s5 }
  0xa4   : > { %v416_v43 = vadd.f32 %v415_v2, %v412_v37  ;;  %v361_v48 = vadd.f32 %v360_v42, %v325_v41  ;;  %p785_p10 = pneg %p784_p8 }
  0xa5   : > { %v395_v45 = vadd.f32 %v394_v36, %v392_v38 }
  0xa6   : > { %v420_v46 = vadd.f32 %v419_v4, %v416_v43  ;;  %p792_p7 = pnand %p791_p2, %p785_p10 }
  0xa7   : > { %v396_v49 = vmul.f32 %v395_v45, %v289_v9 }
  0xa8   : > { %v424_v50 = vadd.f32 %v423_v44, %v420_v46 }
  0xa9   : > { %v397_v53 = vadd.f32 %v396_v49, %v361_v48 }
  0xaa   : > { %v428_v51 = vadd.f32 %v427_v47, %v424_v50 }
  0xac   : > { %v431_v54 = vadd.f32 %v430_v10, %v428_v51 }
  0xae   : > { %v432_v24 = vmul.f32 %v431_v54, %v290_v52 }
  0xb0   : > { %v433_v55 = vadd.f32 %v432_v24, %v397_v53 }
  0xb2   : > { %434 = vst [vmem:[%s278_s22] sm:$0xff] %v433_v55 }
  0xb3   : > { %795 = shalt.err (!%p792_p7)
}
  0xb4   : > { %s796_s1 = scalar_lea.hbm %s1266_s10, 128  ;;  %s800_s8 = scalar_lea.hbm %s1313_s4, 384 }
  0xb5   : > { %p797_p9 = scmp.ne.s32.totalorder %s1266_s10, %s796_s1  ;;  %p801_p4 = scmp.lt.u32.totalorder %s1266_s10, %s1313_s4 }
  0xb6   : > { %p802_p11 = scmp.lt.u32.totalorder %s800_s8, %s796_s1  ;;  %p804_p3 = scmp.lt.u32.totalorder %s796_s1, %s1266_s10 }
  0xb7   : > { %p798_p6 = pnand %p797_p9, %p1335_p0 }
  0xb8   : > { %p803_p13 = por %p802_p11, %p801_p4 }
  0xb9   : > { %p799_p1 = pneg %p798_p6 }
  0xba   : > { %p805_p8 = por %p804_p3, %p803_p13 }
  0xbc   : > { %p806_p10 = pnand %p805_p8, %p799_p1 }
  0xbe   : > { %809 = shalt.err (!%p806_p10)
}
  0xbf   : > { %631 = dma.vmem_to_hbm [thread:$0]  (%p1335_p0), %s1268_s12, 128, %s1266_s10, %s436_s11  }
  0xc0 PF: > { %p656_p12 = scmp.ge.s32.totalorder %s860_s18, 2  ;;  %s461_s25 = sand.u32 1, %s848_s15  }
  0xc1   : > { %p1336_p5 = scmp.ne.s32.totalorder %s1323_s28, 0  ;;  %s462_s2 = scalar_lea.sflag [#allocation4], %s461_s25 }
  0xc3   : > { %p648_p2 = pnand %p656_p12, %p1336_p5 }
  0xc5   : > { %843 = dma.done.wait (!%p648_p2), %s462_s2, 128  }
  0xc6   : > { %845 = vsyncadd (!%p648_p2), %s462_s2, 4294967168  ;;  %p22_p7 = scmp.ge.s32.totalorder %s920_s21, 5   ;;  %s1337_s15 = smov %s852_s16 }
  0xc7   : > { %s1338_s16 = smov %s856_s17  ;;  %s1339_s17 = smov %s932_s24 }
  0xc8   : > { %s1340_s18 = smov %s920_s21  ;;  %24 = sbr.rel (!%p22_p7) target bundleno = 13 (0xd), region = 104 }
  0xcf   :  { %467 = vsyncpa [#allocation3], 1 }
  0xd0   :  { %469 = vsyncpa [#allocation3 + $0x1], 1 }
  0xd1   :  { %470 = vsyncpa [#allocation10], 1 }
  0xd2   :  { %472 = vsyncpa [#allocation10 + $0x1], 1 }
  0xd3   :  { %473 = vsyncpa [#allocation4], 1 }
  0xd4   :  { %475 = vsyncpa [#allocation4 + $0x1], 1 }
  0xd5   :  { %476 = vsyncpa [#allocation5], 1 }
  0xd6   :  { %478 = vsyncpa [#allocation5 + $0x1], 1 }
  0xd7   :  { %479 = vsyncpa [#allocation6], 1 }
  0xd8   :  { %481 = vsyncpa [#allocation6 + $0x1], 1 }

</bundles_post_ra>
